<compile_context>
chip_gen: v6e
topology: v6e:2x2x1
jax: 0.10.0
libtpu: 0.0.40
codegen_flags: <defaults>
</compile_context>

<pallas_src>
import functools

import jax
import jax.numpy as jnp
from jax.experimental import pallas as pl
from jax.experimental.pallas import tpu as pltpu

LANES = 128      # vreg lane width
SUBLANE = 8      # f32 sublane width


def _round_up(n: int, m: int) -> int:
    return (n + m - 1) // m * m


def _mlp_kernel(x_ref, w1_ref, b1_ref, w2_ref, b2_ref, w3_ref, b3_ref, o_ref,
                *, input_size: int):
    x = x_ref[...]                                   # (block, 8); cols >= input_size are zero

    # Layer 1 (K = input_size = 3): three VPU broadcast FMAs, skip the MXU.
    h1 = b1_ref[...]                                 # (1, 128); broadcasts up on first add
    for i in range(input_size):                      # static trace-time unroll
        h1 = h1 + x[:, i:i + 1] * w1_ref[i:i + 1, :]
    h1 = jnp.maximum(h1, 0.0)                        # (block, 128); padded lanes stay 0

    # Layer 2 (100x100 padded to 128x128): the only MXU matmul.
    h2 = jnp.dot(h1, w2_ref[...], preferred_element_type=jnp.float32) + b2_ref[...]
    h2 = jnp.maximum(h2, 0.0)                        # (block, 128); padded lanes stay 0

    # Layer 3 (N = 1): VPU multiply + XLU lane reduction instead of an MXU pass.
    h3 = jnp.sum(h2 * w3_ref[...], axis=-1, keepdims=True)        # (block, 1)
    # b3 is replicated across all 128 lanes; adding it lane-broadcasts h3 so
    # rep[r, l] == relu(h3[r] + b3) for every lane l.
    rep = jnp.maximum(h3 + b3_ref[...], 0.0)                       # (block, 128)

    # Repack batch rows onto lanes: out[g, l] = rep[g*128 + l, l]
    # (diagonal extraction per 128-row group via eye mask + sublane reduce),
    # so the store is a fully lane-dense tile with no replicated HBM traffic.
    eye = (jax.lax.broadcasted_iota(jnp.int32, (LANES, LANES), 0) ==
           jax.lax.broadcasted_iota(jnp.int32, (LANES, LANES), 1)).astype(jnp.float32)
    groups = o_ref.shape[0]                          # block // 128, static
    for g in range(groups):
        seg = rep[g * LANES:(g + 1) * LANES, :]      # (128, 128), static slice
        o_ref[g:g + 1, :] = jnp.sum(seg * eye, axis=0,
                                    keepdims=True).astype(o_ref.dtype)


def _pad_params(params, input_size: int, num: int):
    """Zero-pad parameters to lane/sublane-aligned tiles (zeros are inert)."""
    assert input_size <= SUBLANE, "layer-1 VPU path assumes input_size <= 8"
    assert num <= LANES, "single-tile kernel assumes hidden width <= 128"
    w1, b1, w2, b2, w3, b3 = params
    f32 = jnp.float32
    w1p = jnp.zeros((SUBLANE, LANES), f32).at[:input_size, :num].set(w1)
    b1p = jnp.zeros((1, LANES), f32).at[0, :num].set(b1)
    w2p = jnp.zeros((LANES, LANES), f32).at[:num, :num].set(w2)
    b2p = jnp.zeros((1, LANES), f32).at[0, :num].set(b2)
    w3p = jnp.zeros((1, LANES), f32).at[0, :num].set(w3[:, 0])   # (num,1) -> row
    b3p = jnp.full((1, LANES), b3[0], f32)                       # replicate scalar
    return w1p, b1p, w2p, b2p, w3p, b3p


def dnn1_forward(x, params, *, num: int = 100, block_rows: int = 512):
    """x: (batch, input_size) float32 -> (batch, 1) float32."""
    batch, input_size = x.shape
    w1p, b1p, w2p, b2p, w3p, b3p = _pad_params(params, input_size, num)

    # Batch blocking: block rows are a multiple of 128 (so each block maps to
    # whole lane-major output rows); batch is zero-padded to a whole number of
    # blocks (padded rows compute garbage that is sliced off afterwards).
    block = max(LANES, min(_round_up(block_rows, LANES), _round_up(batch, LANES)))
    padded_batch = _round_up(batch, block)

    # Narrow input slab: only 8 lanes -> 16x less HBM read than a 128-lane pad.
    x_pad = jnp.zeros((padded_batch, SUBLANE), jnp.float32)
    x_pad = x_pad.at[:batch, :input_size].set(x.astype(jnp.float32))

    grid = (padded_batch // block,)
    const = lambda i: (0, 0)   # weights/biases: same block every iteration

    kernel = functools.partial(_mlp_kernel, input_size=input_size)
    out = pl.pallas_call(
        kernel,
        out_shape=jax.ShapeDtypeStruct((padded_batch // LANES, LANES), jnp.float32),
        grid=grid,
        in_specs=[
            pl.BlockSpec((block, SUBLANE), lambda i: (i, 0)),  # x (narrow, 8 lanes)
            pl.BlockSpec((SUBLANE, LANES), const),             # w1
            pl.BlockSpec((1, LANES), const),                   # b1
            pl.BlockSpec((LANES, LANES), const),               # w2
            pl.BlockSpec((1, LANES), const),                   # b2
            pl.BlockSpec((1, LANES), const),                   # w3 (row)
            pl.BlockSpec((1, LANES), const),                   # b3 (replicated)
        ],
        out_specs=pl.BlockSpec((block // LANES, LANES), lambda i: (i, 0)),
        compiler_params=pltpu.CompilerParams(
            dimension_semantics=("parallel",)),                # v7x: shard over 2 TCs
    )(x_pad, w1p, b1p, w2p, b2p, w3p, b3p)

    # Lane-major unpack: out[b // 128, b % 128] holds batch row b.
    return out.reshape(padded_batch, 1)[:batch]


def init_params(key, input_size=3, deep_l=2, num=100):
    """PyTorch-default-style U(-1/sqrt(fan_in), 1/sqrt(fan_in)) init.

    Weights stored (in_features, out_features) (i.e. W^T of nn.Linear),
    biases stored as (out_features,).
    """
    assert deep_l == 2, "This script instantiates the default DNN1(deep_l=2)."
    dims = [(input_size, num), (num, num), (num, 1)]
    params = []
    for fan_in, fan_out in dims:
        key, kw, kb = jax.random.split(key, 3)
        bound = 1.0 / jnp.sqrt(jnp.float32(fan_in))
        w = jax.random.uniform(kw, (fan_in, fan_out), jnp.float32, -bound, bound)
        b = jax.random.uniform(kb, (fan_out,), jnp.float32, -bound, bound)
        params.extend([w, b])
    return tuple(params)


def reference_forward(x, params):
    w1, b1, w2, b2, w3, b3 = params
    hp = jax.lax.Precision.HIGHEST
    h = jnp.maximum(jnp.dot(x, w1, precision=hp) + b1, 0.0)
    h = jnp.maximum(jnp.dot(h, w2, precision=hp) + b2, 0.0)
    return jnp.maximum(jnp.dot(h, w3, precision=hp) + b3, 0.0)


if __name__ == "__main__":
    key = jax.random.PRNGKey(0)
    key, kx, kx2 = jax.random.split(key, 3)

    input_size, num = 3, 100
    params = init_params(key, input_size=input_size, deep_l=2, num=num)

    # Small batch (single grid step).
    batch = 8
    x = jax.random.normal(kx, (batch, input_size), dtype=jnp.float32)
    out = jax.block_until_ready(dnn1_forward(x, params, num=num))
    ref = reference_forward(x, params)
    assert out.shape == (batch, 1), out.shape
    # Tolerance covers possible MXU matmul-pass rounding differences vs the
    # HIGHEST-precision reference while still catching real wiring bugs.
    assert jnp.allclose(out, ref, atol=1e-2, rtol=1e-2), "mismatch vs. JAX reference (batch=8)"

    # Larger batch exercising the batch grid + padding path (grid=(3,)).
    batch2 = 300
    x2 = jax.random.normal(kx2, (batch2, input_size), dtype=jnp.float32)
    out2 = jax.block_until_ready(dnn1_forward(x2, params, num=num, block_rows=128))
    ref2 = reference_forward(x2, params)
    assert out2.shape == (batch2, 1), out2.shape
    assert jnp.allclose(out2, ref2, atol=1e-2, rtol=1e-2), "mismatch vs. JAX reference (batch=300)"

    print("KERNEL_OK")
</pallas_src>

<mosaic_0001>
module attributes {stable_mosaic.version = 11 : i64} {
  func.func @_mlp_kernel(%arg0: i32, %arg1: memref<128x8xf32, #tpu.memory_space<vmem>>, %arg2: memref<8x128xf32, #tpu.memory_space<vmem>>, %arg3: memref<1x128xf32, #tpu.memory_space<vmem>>, %arg4: memref<128x128xf32, #tpu.memory_space<vmem>>, %arg5: memref<1x128xf32, #tpu.memory_space<vmem>>, %arg6: memref<1x128xf32, #tpu.memory_space<vmem>>, %arg7: memref<1x128xf32, #tpu.memory_space<vmem>>, %arg8: memref<1x128xf32, #tpu.memory_space<vmem>>) attributes {dimension_semantics = [#tpu.dimension_semantics<parallel>], iteration_bounds = array<i64: 1>, scalar_prefetch = 0 : i64, scratch_operands = 0 : i64, tpu.core_type = #tpu.core_type<tc>, window_params = [{transform_indices = @transform_0, window_bounds = array<i64: 128, 8>}, {pipeline_mode = #tpu.pipeline_mode<synchronous>, transform_indices = @transform_1, window_bounds = array<i64: 8, 128>}, {pipeline_mode = #tpu.pipeline_mode<synchronous>, transform_indices = @transform_2, window_bounds = array<i64: 1, 128>}, {pipeline_mode = #tpu.pipeline_mode<synchronous>, transform_indices = @transform_3, window_bounds = array<i64: 128, 128>}, {pipeline_mode = #tpu.pipeline_mode<synchronous>, transform_indices = @transform_4, window_bounds = array<i64: 1, 128>}, {pipeline_mode = #tpu.pipeline_mode<synchronous>, transform_indices = @transform_5, window_bounds = array<i64: 1, 128>}, {pipeline_mode = #tpu.pipeline_mode<synchronous>, transform_indices = @transform_6, window_bounds = array<i64: 1, 128>}, {transform_indices = @transform_7, window_bounds = array<i64: 1, 128>}]} {
    %c0 = arith.constant 0 : index
    %c0_0 = arith.constant 0 : index
    %0 = vector.load %arg1[%c0, %c0_0] : memref<128x8xf32, #tpu.memory_space<vmem>>, vector<128x8xf32>
    %c0_1 = arith.constant 0 : index
    %c0_2 = arith.constant 0 : index
    %1 = vector.load %arg3[%c0_1, %c0_2] : memref<1x128xf32, #tpu.memory_space<vmem>>, vector<1x128xf32>
    %2 = vector.extract_strided_slice %0 {offsets = [0, 0], sizes = [128, 1], strides = [1, 1]} : vector<128x8xf32> to vector<128x1xf32>
    %c0_3 = arith.constant 0 : index
    %c0_4 = arith.constant 0 : index
    %3 = vector.load %arg2[%c0_3, %c0_4] : memref<8x128xf32, #tpu.memory_space<vmem>>, vector<1x128xf32>
    %4 = vector.broadcast %2 : vector<128x1xf32> to vector<128x128xf32>
    %5 = vector.broadcast %3 : vector<1x128xf32> to vector<128x128xf32>
    %6 = arith.mulf %4, %5 : vector<128x128xf32>
    %7 = vector.broadcast %1 : vector<1x128xf32> to vector<128x128xf32>
    %8 = arith.addf %7, %6 : vector<128x128xf32>
    %9 = vector.extract_strided_slice %0 {offsets = [0, 1], sizes = [128, 1], strides = [1, 1]} : vector<128x8xf32> to vector<128x1xf32>
    %c1 = arith.constant 1 : index
    %c0_5 = arith.constant 0 : index
    %10 = vector.load %arg2[%c1, %c0_5] : memref<8x128xf32, #tpu.memory_space<vmem>>, vector<1x128xf32>
    %11 = vector.broadcast %9 : vector<128x1xf32> to vector<128x128xf32>
    %12 = vector.broadcast %10 : vector<1x128xf32> to vector<128x128xf32>
    %13 = arith.mulf %11, %12 : vector<128x128xf32>
    %14 = arith.addf %8, %13 : vector<128x128xf32>
    %15 = vector.extract_strided_slice %0 {offsets = [0, 2], sizes = [128, 1], strides = [1, 1]} : vector<128x8xf32> to vector<128x1xf32>
    %c2 = arith.constant 2 : index
    %c0_6 = arith.constant 0 : index
    %16 = vector.load %arg2[%c2, %c0_6] : memref<8x128xf32, #tpu.memory_space<vmem>>, vector<1x128xf32>
    %17 = vector.broadcast %15 : vector<128x1xf32> to vector<128x128xf32>
    %18 = vector.broadcast %16 : vector<1x128xf32> to vector<128x128xf32>
    %19 = arith.mulf %17, %18 : vector<128x128xf32>
    %20 = arith.addf %14, %19 : vector<128x128xf32>
    %cst = arith.constant 0.000000e+00 : f32
    %21 = vector.broadcast %cst : f32 to vector<128x128xf32>
    %22 = arith.maximumf %20, %21 : vector<128x128xf32>
    %c0_7 = arith.constant 0 : index
    %c0_8 = arith.constant 0 : index
    %23 = vector.load %arg4[%c0_7, %c0_8] : memref<128x128xf32, #tpu.memory_space<vmem>>, vector<128x128xf32>
    %cst_9 = arith.constant dense<0.000000e+00> : vector<128x128xf32>
    %24 = tpu.matmul %22, %23, %cst_9 {dimension_numbers = #tpu.dot_dimension_numbers<[1], [0], [0], [1], [0, 0, 1, 1], [], []>} : vector<128x128xf32>, vector<128x128xf32>, vector<128x128xf32> -> vector<128x128xf32>
    %c0_10 = arith.constant 0 : index
    %c0_11 = arith.constant 0 : index
    %25 = vector.load %arg5[%c0_10, %c0_11] : memref<1x128xf32, #tpu.memory_space<vmem>>, vector<1x128xf32>
    %26 = vector.broadcast %25 : vector<1x128xf32> to vector<128x128xf32>
    %27 = arith.addf %24, %26 : vector<128x128xf32>
    %cst_12 = arith.constant 0.000000e+00 : f32
    %28 = vector.broadcast %cst_12 : f32 to vector<128x128xf32>
    %29 = arith.maximumf %27, %28 : vector<128x128xf32>
    %c0_13 = arith.constant 0 : index
    %c0_14 = arith.constant 0 : index
    %30 = vector.load %arg6[%c0_13, %c0_14] : memref<1x128xf32, #tpu.memory_space<vmem>>, vector<1x128xf32>
    %31 = vector.broadcast %30 : vector<1x128xf32> to vector<128x128xf32>
    %32 = arith.mulf %29, %31 : vector<128x128xf32>
    %cst_15 = arith.constant dense<0.000000e+00> : vector<128xf32>
    %33 = vector.multi_reduction <add>, %32, %cst_15 [1] : vector<128x128xf32> to vector<128xf32>
    %34 = vector.shape_cast %33 : vector<128xf32> to vector<128x1xf32>
    %c0_16 = arith.constant 0 : index
    %c0_17 = arith.constant 0 : index
    %35 = vector.load %arg7[%c0_16, %c0_17] : memref<1x128xf32, #tpu.memory_space<vmem>>, vector<1x128xf32>
    %36 = vector.broadcast %34 : vector<128x1xf32> to vector<128x128xf32>
    %37 = vector.broadcast %35 : vector<1x128xf32> to vector<128x128xf32>
    %38 = arith.addf %36, %37 : vector<128x128xf32>
    %cst_18 = arith.constant 0.000000e+00 : f32
    %39 = vector.broadcast %cst_18 : f32 to vector<128x128xf32>
    %40 = arith.maximumf %38, %39 : vector<128x128xf32>
    %41 = tpu.iota {dimensions = array<i32: 0>} : vector<128x128xi32>
    %42 = tpu.iota {dimensions = array<i32: 1>} : vector<128x128xi32>
    %43 = arith.cmpi eq, %41, %42 : vector<128x128xi32>
    %44 = arith.extui %43 : vector<128x128xi1> to vector<128x128xi32>
    %45 = arith.sitofp %44 : vector<128x128xi32> to vector<128x128xf32>
    %46 = arith.mulf %40, %45 : vector<128x128xf32>
    %cst_19 = arith.constant dense<0.000000e+00> : vector<128xf32>
    %47 = vector.multi_reduction <add>, %46, %cst_19 [0] : vector<128x128xf32> to vector<128xf32>
    %48 = vector.shape_cast %47 : vector<128xf32> to vector<1x128xf32>
    %c0_20 = arith.constant 0 : index
    %c0_21 = arith.constant 0 : index
    %49 = vector.load %arg8[%c0_20, %c0_21] : memref<1x128xf32, #tpu.memory_space<vmem>>, vector<1x128xf32>
    tpu.vector_store %arg8[%c0_20, %c0_21], %48 {strides = array<i32>} : memref<1x128xf32, #tpu.memory_space<vmem>>, vector<1x128xf32>,
    return
  }
  func.func @transform_0(%arg0: i32) -> (i32, i32) {
    %c0_i32 = arith.constant 0 : i32
    %c0_i32_0 = arith.constant 0 : i32
    return %arg0, %c0_i32 : i32, i32
  }
  func.func @transform_1(%arg0: i32) -> (i32, i32) {
    %c0_i32 = arith.constant 0 : i32
    %c0_i32_0 = arith.constant 0 : i32
    %c0_i32_1 = arith.constant 0 : i32
    return %c0_i32, %c0_i32_0 : i32, i32
  }
  func.func @transform_2(%arg0: i32) -> (i32, i32) {
    %c0_i32 = arith.constant 0 : i32
    %c0_i32_0 = arith.constant 0 : i32
    %c0_i32_1 = arith.constant 0 : i32
    return %c0_i32, %c0_i32_0 : i32, i32
  }
  func.func @transform_3(%arg0: i32) -> (i32, i32) {
    %c0_i32 = arith.constant 0 : i32
    %c0_i32_0 = arith.constant 0 : i32
    %c0_i32_1 = arith.constant 0 : i32
    return %c0_i32, %c0_i32_0 : i32, i32
  }
  func.func @transform_4(%arg0: i32) -> (i32, i32) {
    %c0_i32 = arith.constant 0 : i32
    %c0_i32_0 = arith.constant 0 : i32
    %c0_i32_1 = arith.constant 0 : i32
    return %c0_i32, %c0_i32_0 : i32, i32
  }
  func.func @transform_5(%arg0: i32) -> (i32, i32) {
    %c0_i32 = arith.constant 0 : i32
    %c0_i32_0 = arith.constant 0 : i32
    %c0_i32_1 = arith.constant 0 : i32
    return %c0_i32, %c0_i32_0 : i32, i32
  }
  func.func @transform_6(%arg0: i32) -> (i32, i32) {
    %c0_i32 = arith.constant 0 : i32
    %c0_i32_0 = arith.constant 0 : i32
    %c0_i32_1 = arith.constant 0 : i32
    return %c0_i32, %c0_i32_0 : i32, i32
  }
  func.func @transform_7(%arg0: i32) -> (i32, i32) {
    %c0_i32 = arith.constant 0 : i32
    %c0_i32_0 = arith.constant 0 : i32
    return %arg0, %c0_i32 : i32, i32
  }
}

</mosaic_0001>

<bundles_post_ra>
// kernel: tpu_custom_call.1
= control target key start
LH: loop header
LB: loop body
LE: loop exit
PB: predicated region body
PF: predicated region fallthrough
CT: control target
= control target key end

     0   :  { %v978_v1 = vmov 1   ;;  %v979_v2 = vmov 0   ;;  %v980_v8 = vmov 2   ;;  %s1378_s0 = inlined_call_operand.vmem [shape: f32[128,8], index: 0, kind: input, shape index: {}]   ;;  %s1379_s1 = inlined_call_operand.vmem [shape: f32[8,128], index: 1, kind: input, shape index: {}]   ;;  %s1380_s2 = inlined_call_operand.vmem [shape: f32[1,128], index: 2, kind: input, shape index: {}]   ;;  %s1381_s3 = inlined_call_operand.vmem [shape: f32[128,128], index: 3, kind: input, shape index: {}]   ;;  %s1382_s4 = inlined_call_operand.vmem [shape: f32[1,128], index: 4, kind: input, shape index: {}]   ;;  %s1383_s5 = inlined_call_operand.vmem [shape: f32[1,128], index: 5, kind: input, shape index: {}]   ;;  %s1384_s6 = inlined_call_operand.vmem [shape: f32[1,128], index: 6, kind: input, shape index: {}]   ;;  %s1385_s7 = inlined_call_operand.hbm [shape: f32[1,128], index: 7, kind: output, shape index: {}]  }
   0x1   :  { %v27_v0 = vld [vmem:[%s1378_s0] sm:$0xff]  ;;  %931 = vset.pattern.permute.xlu1 %v978_v1  ;;  %930 = vset.pattern.permute.xlu0 %v979_v2  ;;  %v28_v3 = vld [vmem:[%s1378_s0 + $0x8] sm:$0xff]  ;;  %v400_v4 = vld [vmem:[%s1381_s3 + $0x78] sm:$0xff] }
   0x2   :  { %169 = vperm.xlu1 %931, %v27_v0   ;;  %47 = vperm.xlu0 %930, %v27_v0   ;;  %v399_v5 = vld [vmem:[%s1381_s3 + $0x70] sm:$0xff]  ;;  %v398_v7 = vld [vmem:[%s1381_s3 + $0x68] sm:$0xff]  ;;  %v30_v9 = vld [vmem:[%s1378_s0 + $0x18] sm:$0xff] }
   0x3   :  { %v1040_v6 = vld [vmem:[%s1378_s0 + $0x10] sm:$0xff]  ;;  %837 = vmatprep.subr.mxu0 %v400_v4  ;;  %893 = vmatprep.subr.mxu1 %v400_v4  ;;  %v397_v10 = vld [vmem:[%s1381_s3 + $0x60] sm:$0xff] }
   0x4   :  { %838 = vmatpush3.msra.mxu0 %v400_v4  ;;  %909 = vmatpush3.msra.mxu1 %v400_v4 }
   0x5   :  { %839 = vmatprep.subr.mxu0 %v399_v5  ;;  %894 = vmatprep.subr.mxu1 %v399_v5 }
   0x6   :  { %173 = vperm.xlu1 %931, %v28_v3   ;;  %52 = vperm.xlu0 %930, %v28_v3  }
   0x7   :  { %840 = vmatpush3.msra.mxu0 %v399_v5 }
   0xa   :  { %932 = vset.pattern.permute.xlu1 %v980_v8  ;;  %57 = vperm.xlu0 %930, %v1040_v6  }
   0xb   :  { %270 = vperm.xlu1 %932, %v27_v0  }
   0xc   :  { %12 = vsyncpa [#allocation3], 0  ;;  %841 = vmatprep.subr.mxu0 %v398_v7  ;;  %910 = vmatpush3.msra.mxu1 %v399_v5  ;;  %v396_v11 = vld [vmem:[%s1381_s3 + $0x58] sm:$0xff]  ;;  %v395_v12 = vld [vmem:[%s1381_s3 + $0x50] sm:$0xff] }
   0xd   :  { %842 = vmatpush3.msra.mxu0 %v398_v7  ;;  %895 = vmatprep.subr.mxu1 %v398_v7  ;;  %v394_v13 = vld [vmem:[%s1381_s3 + $0x48] sm:$0xff]  ;;  %v1068_v14 = vld [vmem:[%s1378_s0 + $0x20] sm:$0xff]  ;;  %v392_v16 = vld [vmem:[%s1381_s3 + $0x38] sm:$0xff] }
   0xe   :  { %62 = vperm.xlu0 %930, %v30_v9   ;;  %843 = vmatprep.subr.mxu0 %v397_v10  ;;  %v393_v15 = vld [vmem:[%s1381_s3 + $0x40] sm:$0xff]  ;;  %v33_v17 = vld [vmem:[%s1378_s0 + $0x30] sm:$0xff]  ;;  %v32_v19 = vld [vmem:[%s1378_s0 + $0x28] sm:$0xff] }
   0xf   :  { %274 = vperm.xlu1 %932, %v28_v3   ;;  %844 = vmatpush3.msra.mxu0 %v397_v10  ;;  %v391_v18 = vld [vmem:[%s1381_s3 + $0x30] sm:$0xff]  ;;  %v390_v20 = vld [vmem:[%s1381_s3 + $0x28] sm:$0xff]  ;;  %v1094_v21 = vld [vmem:[%s1378_s0 + $0x40] sm:$0xff] }
  0x10   :  { %845 = vmatprep.subr.mxu0 %v396_v11  ;;  %911 = vmatpush3.msra.mxu1 %v398_v7  ;;  %v389_v22 = vld [vmem:[%s1381_s3 + $0x20] sm:$0xff]  ;;  %v388_v23 = vld [vmem:[%s1381_s3 + $0x18] sm:$0xff]  ;;  %v1106_v24 = vld [vmem:[%s1378_s0 + $0x50] sm:$0xff] }
  0x11   :  { %846 = vmatpush3.msra.mxu0 %v396_v11  ;;  %896 = vmatprep.subr.mxu1 %v397_v10  ;;  %v387_v25 = vld [vmem:[%s1381_s3 + $0x10] sm:$0xff]  ;;  %v386_v26 = vld [vmem:[%s1381_s3 + $0x8] sm:$0xff]  ;;  %v1119_v27 = vld [vmem:[%s1378_s0 + $0x60] sm:$0xff] }
  0x12   :  { %935 = vset.pattern.permute.xlu0 %v980_v8  ;;  %847 = vmatprep.subr.mxu0 %v395_v12  ;;  %v385_v28 = vld [vmem:[%s1381_s3] sm:$0xff]  ;;  %v34_v29 = vld [vmem:[%s1378_s0 + $0x38] sm:$0xff]  ;;  %v36_v30 = vld [vmem:[%s1378_s0 + $0x48] sm:$0xff] }
  0x13   :  { %933 = vset.pattern.permute.xlu1 %v978_v1  ;;  %278 = vperm.xlu0 %935, %v1040_v6   ;;  %v41_v31 = vld [vmem:[%s1378_s0 + $0x70] sm:$0xff]  ;;  %v42_v32 = vld [vmem:[%s1378_s0 + $0x78] sm:$0xff]  ;;  %v40_v34 = vld [vmem:[%s1378_s0 + $0x68] sm:$0xff] }
  0x14   :  { %181 = vperm.xlu1 %933, %v30_v9   ;;  %848 = vmatpush3.msra.mxu0 %v395_v12  ;;  %v38_v33 = vld [vmem:[%s1378_s0 + $0x58] sm:$0xff]  ;;  %v1170_v35 = vld [vmem:[%s1379_s1] ss:$0 sm:$0xff]  ;;  %v1182_v42 = vld [vmem:[%s1379_s1 + $0x1] ss:$0 sm:$0xff] }
  0x15   :  { %849 = vmatprep.subr.mxu0 %v394_v13  ;;  %912 = vmatpush3.msra.mxu1 %v397_v10  ;;  %v1176_v39 = vld [vmem:[%s1380_s2] ss:$0 sm:$0xff]  ;;  %v1189_v45 = vld [vmem:[%s1379_s1 + $0x2] ss:$0 sm:$0xff] }
  0x16   :  { %850 = vmatpush3.msra.mxu0 %v394_v13  ;;  %897 = vmatprep.subr.mxu1 %v396_v11 }
  0x17   :  { %286 = vperm.xlu0 %935, %v1068_v14   ;;  %851 = vmatprep.subr.mxu0 %v393_v15 }
  0x18   :  { %934 = vset.pattern.permute.xlu1 %v979_v2  ;;  %852 = vmatpush3.msra.mxu0 %v393_v15 }
  0x19   :  { %67 = vperm.xlu1 %934, %v1068_v14   ;;  %853 = vmatprep.subr.mxu0 %v392_v16 }
  0x1a   :  { %854 = vmatpush3.msra.mxu0 %v392_v16  ;;  %913 = vmatpush3.msra.mxu1 %v396_v11 }
  0x1b   :  { %294 = vperm.xlu0 %935, %v33_v17   ;;  %855 = vmatprep.subr.mxu0 %v391_v18 }
  0x1c   :  { %856 = vmatpush3.msra.mxu0 %v391_v18  ;;  %898 = vmatprep.subr.mxu1 %v395_v12 }
  0x1d   :  { %72 = vperm.xlu1 %934, %v32_v19   ;;  %857 = vmatprep.subr.mxu0 %v390_v20 }
  0x1e   :  { %858 = vmatpush3.msra.mxu0 %v390_v20  ;;  %914 = vmatpush3.msra.mxu1 %v395_v12 }
  0x1f   :  { %302 = vperm.xlu0 %935, %v1094_v21   ;;  %859 = vmatprep.subr.mxu0 %v389_v22 }
  0x20   :  { %860 = vmatpush3.msra.mxu0 %v389_v22  ;;  %899 = vmatprep.subr.mxu1 %v394_v13 }
  0x21   :  { %936 = vset.pattern.permute.xlu1 %v980_v8  ;;  %861 = vmatprep.subr.mxu0 %v388_v23 }
  0x22   :  { %282 = vperm.xlu1 %936, %v30_v9   ;;  %862 = vmatpush3.msra.mxu0 %v388_v23 }
  0x23   :  { %310 = vperm.xlu0 %935, %v1106_v24   ;;  %863 = vmatprep.subr.mxu0 %v387_v25 }
  0x24   :  { %864 = vmatpush3.msra.mxu0 %v387_v25  ;;  %915 = vmatpush3.msra.mxu1 %v394_v13 }
  0x25   :  { %865 = vmatprep.subr.mxu0 %v386_v26  ;;  %900 = vmatprep.subr.mxu1 %v393_v15 }
  0x26   :  { %937 = vset.pattern.permute.xlu1 %v978_v1  ;;  %866 = vmatpush3.msra.mxu0 %v386_v26 }
  0x27   :  { %189 = vperm.xlu1 %937, %v32_v19   ;;  %318 = vperm.xlu0 %935, %v1119_v27  }
  0x28   :  { %867 = vmatprep.subr.mxu0 %v385_v28  ;;  %916 = vmatpush3.msra.mxu1 %v393_v15 }
  0x29   :  { %868 = vmatpush3.msra.mxu0 %v385_v28  ;;  %901 = vmatprep.subr.mxu1 %v392_v16 }
  0x2a   :  { %917 = vmatpush3.msra.mxu1 %v392_v16 }
  0x2b   :  { %938 = vset.pattern.permute.xlu1 %v979_v2  ;;  %951 = vset.pattern.permute.xlu0 %v978_v1 }
  0x2c   :  { %77 = vperm.xlu1 %938, %v33_v17   ;;  %177 = vperm.xlu0 %951, %v1040_v6  }
  0x2d   :  { %902 = vmatprep.subr.mxu1 %v391_v18 }
  0x2e   :  { %918 = vmatpush3.msra.mxu1 %v391_v18 }
  0x2f   :  { %903 = vmatprep.subr.mxu1 %v390_v20 }
  0x30   :  { %82 = vperm.xlu1 %938, %v34_v29   ;;  %185 = vperm.xlu0 %951, %v1068_v14  }
  0x31   :  { %919 = vmatpush3.msra.mxu1 %v390_v20 }
  0x32   :  { %904 = vmatprep.subr.mxu1 %v389_v22 }
  0x33   :  { %920 = vmatpush3.msra.mxu1 %v389_v22 }
  0x34   :  { %939 = vset.pattern.permute.xlu1 %v980_v8  ;;  %193 = vperm.xlu0 %951, %v33_v17  }
  0x35   :  { %290 = vperm.xlu1 %939, %v32_v19   ;;  %905 = vmatprep.subr.mxu1 %v388_v23 }
  0x36   :  { %921 = vmatpush3.msra.mxu1 %v388_v23 }
  0x37   :  { %906 = vmatprep.subr.mxu1 %v387_v25 }
  0x38   :  { %201 = vperm.xlu0 %951, %v1094_v21   ;;  %922 = vmatpush3.msra.mxu1 %v387_v25 }
  0x39   :  { %940 = vset.pattern.permute.xlu1 %v978_v1  ;;  %907 = vmatprep.subr.mxu1 %v386_v26 }
  0x3a   :  { %197 = vperm.xlu1 %940, %v34_v29   ;;  %923 = vmatpush3.msra.mxu1 %v386_v26 }
  0x3b   :  { %908 = vmatprep.subr.mxu1 %v385_v28 }
  0x3c   :  { %209 = vperm.xlu0 %951, %v1106_v24   ;;  %924 = vmatpush3.msra.mxu1 %v385_v28 }
  0x3e   :  { %941 = vset.pattern.permute.xlu1 %v979_v2 }
  0x3f   :  { %87 = vperm.xlu1 %941, %v1094_v21  }
  0x40   :  { %217 = vperm.xlu0 %951, %v1119_v27  }
  0x43   :  { %92 = vperm.xlu1 %941, %v36_v30  }
  0x44   :  { %225 = vperm.xlu0 %951, %v41_v31  }
  0x47   :  { %942 = vset.pattern.permute.xlu1 %v980_v8 }
  0x48   :  { %298 = vperm.xlu1 %942, %v34_v29   ;;  %955 = vset.pattern.permute.xlu0 %v980_v8 }
  0x49   :  { %330 = vperm.xlu0 %955, %v42_v32  }
  0x4c   :  { %943 = vset.pattern.permute.xlu1 %v978_v1 }
  0x4d   :  { %205 = vperm.xlu1 %943, %v36_v30  }
  0x51   :  { %944 = vset.pattern.permute.xlu1 %v979_v2 }
  0x52   :  { %97 = vperm.xlu1 %944, %v1106_v24  }
  0x56   :  { %102 = vperm.xlu1 %944, %v38_v33  }
  0x5a   :  { %945 = vset.pattern.permute.xlu1 %v980_v8 }
  0x5b   :  { %306 = vperm.xlu1 %945, %v36_v30  }
  0x5f   :  { %946 = vset.pattern.permute.xlu1 %v978_v1 }
  0x60   :  { %213 = vperm.xlu1 %946, %v38_v33  }
  0x64   :  { %947 = vset.pattern.permute.xlu1 %v979_v2 }
  0x65   :  { %107 = vperm.xlu1 %947, %v1119_v27  }
  0x69   :  { %112 = vperm.xlu1 %947, %v40_v34  }
  0x6d   :  { %948 = vset.pattern.permute.xlu1 %v980_v8 }
  0x6e   :  { %314 = vperm.xlu1 %948, %v38_v33  }
  0x72   :  { %949 = vset.pattern.permute.xlu1 %v978_v1 }
  0x73   :  { %221 = vperm.xlu1 %949, %v40_v34  }
  0x77   :  { %950 = vset.pattern.permute.xlu1 %v979_v2 }
  0x78   :  { %117 = vperm.xlu1 %950, %v41_v31  }
  0x7c   :  { %122 = vperm.xlu1 %950, %v42_v32  }
  0x7d   :  { %v170_v36 = vpop.permute.xlu1 %169  ;;  %v48_v37 = vpop.permute.xlu0 %47 }
  0x7e   :  { %v129_v38 = vmul.f32 %v1170_v35, %v48_v37  ;;  %v236_v46 = vmul.f32 %v1182_v42, %v170_v36 }
  0x80   :  { %952 = vset.pattern.permute.xlu1 %v980_v8  ;;  %v151_v43 = vadd.f32 %v1176_v39, %v129_v38 }
  0x81   :  { %322 = vperm.xlu1 %952, %v40_v34   ;;  %v174_v40 = vpop.permute.xlu1 %173  ;;  %v53_v41 = vpop.permute.xlu0 %52 }
  0x82   :  { %v130_v44 = vmul.f32 %v1170_v35, %v53_v41  ;;  %v252_v51 = vadd.f32 %v236_v46, %v151_v43  ;;  %v237_v52 = vmul.f32 %v1182_v42, %v174_v40 }
  0x84   :  { %v152_v49 = vadd.f32 %v1176_v39, %v130_v44 }
  0x85   :  { %953 = vset.pattern.permute.xlu1 %v978_v1  ;;  %v58_v47 = vpop.permute.xlu0 %57 }
  0x86   :  { %229 = vperm.xlu1 %953, %v42_v32   ;;  %v271_v48 = vpop.permute.xlu1 %270  ;;  %v253_v56 = vadd.f32 %v237_v52, %v152_v49  ;;  %v131_v7 = vmul.f32 %v1170_v35, %v58_v47 }
  0x87   :  { %v337_v50 = vmul.f32 %v1189_v45, %v271_v48 }
  0x88   :  { %v153_v12 = vadd.f32 %v1176_v39, %v131_v7 }
  0x89   :  { %v63_v53 = vpop.permute.xlu0 %62  ;;  %v353_v54 = vadd.f32 %v337_v50, %v252_v51 }
  0x8a   :  { %954 = vset.pattern.permute.xlu1 %v980_v8  ;;  %v275_v55 = vpop.permute.xlu1 %274  ;;  %v132_v6 = vmul.f32 %v1170_v35, %v63_v53 }
  0x8b   :  { %v338_v57 = vmul.f32 %v1189_v45, %v275_v55  ;;  %326 = vperm.xlu1 %954, %v41_v31   ;;  %v369_v58 = vmax.f32 %v353_v54, 0.0 }
  0x8c   :  { %v154_v10 = vadd.f32 %v1176_v39, %v132_v6 }
  0x8d   :  { %v354_v59 = vadd.f32 %v338_v57, %v253_v56  ;;  %869 = vmatprep.mubr.f32.mxu0 %v369_v58 }
  0x8e   :  { %v279_v60 = vpop.permute.xlu0 %278 }
  0x8f   :  { %v370_v61 = vmax.f32 %v354_v59, 0.0  ;;  %v182_v62 = vpop.permute.xlu1 %181  ;;  %v339_v16 = vmul.f32 %v1189_v45, %v279_v60 }
  0x90   :  { %v239_v11 = vmul.f32 %v1182_v42, %v182_v62 }
  0x91   :  { %870 = vmatmul.mubr.f32.vlgmr.msra.gmra.mxu0 %v370_v61 }
  0x92   :  { %v287_v63 = vpop.permute.xlu0 %286  ;;  %v255_v19 = vadd.f32 %v239_v11, %v154_v10 }
  0x93   :  { %v341_v21 = vmul.f32 %v1189_v45, %v287_v63 }
  0x94   :  { %v68_v0 = vpop.permute.xlu1 %67 }
  0x95   :  { %v133_v17 = vmul.f32 %v1170_v35, %v68_v0 }
  0x96   :  { %v295_v1 = vpop.permute.xlu0 %294 }
  0x97   :  { %v155_v26 = vadd.f32 %v1176_v39, %v133_v17  ;;  %v343_v37 = vmul.f32 %v1189_v45, %v295_v1 }
  0x98   :  { %v73_v2 = vpop.permute.xlu1 %72 }
  0x99   :  { %v134_v22 = vmul.f32 %v1170_v35, %v73_v2 }
  0x9a   :  { %v303_v3 = vpop.permute.xlu0 %302 }
  0x9b   :  { %v156_v33 = vadd.f32 %v1176_v39, %v134_v22  ;;  %v345_v58 = vmul.f32 %v1189_v45, %v303_v3 }
  0x9d   :  { %v283_v4 = vpop.permute.xlu1 %282 }
  0x9e   :  { %v1198_v5 = vpop.permute.xlu0 %310  ;;  %v340_v13 = vmul.f32 %v1189_v45, %v283_v4 }
  0xa0   :  { %v356_v23 = vadd.f32 %v340_v13, %v255_v19  ;;  %v347_v19 = vmul.f32 %v1189_v45, %v1198_v5 }
  0xa2   :  { %v190_v8 = vpop.permute.xlu1 %189  ;;  %v1202_v9 = vpop.permute.xlu0 %318  ;;  %v372_v34 = vmax.f32 %v356_v23, 0.0 }
  0xa3   :  { %v241_v30 = vmul.f32 %v1182_v42, %v190_v8 }
  0xa5   :  { %v257_v44 = vadd.f32 %v241_v30, %v156_v33 }
  0xa7   :  { %v78_v14 = vpop.permute.xlu1 %77  ;;  %v178_v15 = vpop.permute.xlu0 %177 }
  0xa8   :  { %v238_v18 = vmul.f32 %v1182_v42, %v178_v15  ;;  %v135_v27 = vmul.f32 %v1170_v35, %v78_v14 }
  0xaa   :  { %v254_v20 = vadd.f32 %v238_v18, %v153_v12  ;;  %v157_v38 = vadd.f32 %v1176_v39, %v135_v27 }
  0xab   :  { %v83_v24 = vpop.permute.xlu1 %82  ;;  %v186_v25 = vpop.permute.xlu0 %185 }
  0xac   :  { %v240_v28 = vmul.f32 %v1182_v42, %v186_v25  ;;  %v355_v29 = vadd.f32 %v339_v16, %v254_v20  ;;  %v136_v60 = vmul.f32 %v1170_v35, %v83_v24 }
  0xae   :  { %v256_v31 = vadd.f32 %v240_v28, %v155_v26  ;;  %v371_v32 = vmax.f32 %v355_v29, 0.0  ;;  %v158_v1 = vadd.f32 %v1176_v39, %v136_v60 }
  0xaf   :  { %v194_v36 = vpop.permute.xlu0 %193 }
  0xb0   :  { %v242_v40 = vmul.f32 %v1182_v42, %v194_v36  ;;  %v291_v41 = vpop.permute.xlu1 %290  ;;  %872 = vmatprep.mubr.f32.mxu0 %v371_v32  ;;  %v357_v43 = vadd.f32 %v341_v21, %v256_v31 }
  0xb1   :  { %v342_v46 = vmul.f32 %v1189_v45, %v291_v41  ;;  %873 = vmatmul.mubr.f32.gmra.mxu0 %v372_v34  ;;  %v349_v41 = vmul.f32 %v1189_v45, %v1202_v9 }
  0xb2   :  { %v258_v47 = vadd.f32 %v242_v40, %v157_v38  ;;  %v373_v48 = vmax.f32 %v357_v43, 0.0 }
  0xb3   :  { %v358_v49 = vadd.f32 %v342_v46, %v257_v44  ;;  %v202_v54 = vpop.permute.xlu0 %201 }
  0xb4   :  { %875 = vmatprep.mubr.f32.mxu0 %v373_v48  ;;  %v359_v50 = vadd.f32 %v343_v37, %v258_v47  ;;  %v244_v57 = vmul.f32 %v1182_v42, %v202_v54 }
  0xb5   :  { %v374_v51 = vmax.f32 %v358_v49, 0.0  ;;  %v198_v52 = vpop.permute.xlu1 %197 }
  0xb6   :  { %v375_v53 = vmax.f32 %v359_v50, 0.0  ;;  %v243_v63 = vmul.f32 %v1182_v42, %v198_v52 }
  0xb7   :  { %876 = vmatmul.mubr.f32.gmra.mxu0 %v374_v51  ;;  %v210_v12 = vpop.permute.xlu0 %209 }
  0xb8   :  { %878 = vmatprep.mubr.f32.mxu0 %v375_v53  ;;  %v259_v6 = vadd.f32 %v243_v63, %v158_v1  ;;  %v246_v15 = vmul.f32 %v1182_v42, %v210_v12 }
  0xba   :  { %v88_v55 = vpop.permute.xlu1 %87 }
  0xbb   :  { %v137_v56 = vmul.f32 %v1170_v35, %v88_v55  ;;  %v218_v31 = vpop.permute.xlu0 %217 }
  0xbc   :  { %v248_v33 = vmul.f32 %v1182_v42, %v218_v31 }
  0xbd   :  { %v159_v59 = vadd.f32 %v1176_v39, %v137_v56 }
  0xbe   :  { %v93_v61 = vpop.permute.xlu1 %92 }
  0xbf   :  { %v260_v62 = vadd.f32 %v244_v57, %v159_v59  ;;  %v138_v16 = vmul.f32 %v1170_v35, %v93_v61  ;;  %v226_v57 = vpop.permute.xlu0 %225 }
  0xc1   :  { %v361_v0 = vadd.f32 %v345_v58, %v260_v62  ;;  %v160_v21 = vadd.f32 %v1176_v39, %v138_v16 }
  0xc3   :  { %v299_v2 = vpop.permute.xlu1 %298  ;;  %v377_v4 = vmax.f32 %v361_v0, 0.0 }
  0xc4   :  { %v344_v7 = vmul.f32 %v1189_v45, %v299_v2  ;;  %v331_v1 = vpop.permute.xlu0 %330 }
  0xc5   :  { %881 = vmatprep.mubr.f32.mxu1 %v377_v4 }
  0xc6   :  { %v360_v8 = vadd.f32 %v344_v7, %v259_v6 }
  0xc8   :  { %v376_v10 = vmax.f32 %v360_v8, 0.0  ;;  %v206_v3 = vpop.permute.xlu1 %205  ;;  %v352_v8 = vmul.f32 %v1189_v45, %v331_v1 }
  0xc9   :  { %v245_v18 = vmul.f32 %v1182_v42, %v206_v3 }
  0xca   :  { %879 = vmatmul.mubr.f32.gmra.mxu0 %v376_v10  ;;  %v250_v10 = vmul.f32 %v1182_v42, %v226_v57 }
  0xcb   :  { %v261_v23 = vadd.f32 %v245_v18, %v160_v21 }
  0xcd   :  { %v98_v11 = vpop.permute.xlu1 %97 }
  0xce   :  { %v139_v13 = vmul.f32 %v1170_v35, %v98_v11 }
  0xd0   :  { %v161_v14 = vadd.f32 %v1176_v39, %v139_v13 }
  0xd1   :  { %v103_v17 = vpop.permute.xlu1 %102 }
  0xd2   :  { %v262_v20 = vadd.f32 %v246_v15, %v161_v14  ;;  %v140_v34 = vmul.f32 %v1170_v35, %v103_v17 }
  0xd4   :  { %v363_v25 = vadd.f32 %v347_v19, %v262_v20  ;;  %v162_v40 = vadd.f32 %v1176_v39, %v140_v34 }
  0xd6   :  { %v307_v22 = vpop.permute.xlu1 %306  ;;  %v379_v29 = vmax.f32 %v363_v25, 0.0 }
  0xd7   :  { %v346_v24 = vmul.f32 %v1189_v45, %v307_v22 }
  0xd9   :  { %v362_v26 = vadd.f32 %v346_v24, %v261_v23 }
  0xdb   :  { %v378_v27 = vmax.f32 %v362_v26, 0.0  ;;  %v214_v28 = vpop.permute.xlu1 %213 }
  0xdc   :  { %v247_v37 = vmul.f32 %v1182_v42, %v214_v28 }
  0xdd   :  { %882 = vmatmul.mubr.f32.vlgmr.msra.gmra.mxu1 %v378_v27 }
  0xde   :  { %884 = vmatprep.mubr.f32.mxu1 %v379_v29  ;;  %v263_v44 = vadd.f32 %v247_v37, %v162_v40 }
  0xe0   :  { %v108_v30 = vpop.permute.xlu1 %107 }
  0xe1   :  { %v141_v32 = vmul.f32 %v1170_v35, %v108_v30 }
  0xe3   :  { %v163_v5 = vadd.f32 %v1176_v39, %v141_v32 }
  0xe4   :  { %v113_v36 = vpop.permute.xlu1 %112 }
  0xe5   :  { %v264_v38 = vadd.f32 %v248_v33, %v163_v5  ;;  %v142_v53 = vmul.f32 %v1170_v35, %v113_v36 }
  0xe7   :  { %v365_v47 = vadd.f32 %v349_v41, %v264_v38  ;;  %v164_v56 = vadd.f32 %v1176_v39, %v142_v53 }
  0xe9   :  { %v315_v43 = vpop.permute.xlu1 %314  ;;  %v381_v51 = vmax.f32 %v365_v47, 0.0 }
  0xea   :  { %v348_v46 = vmul.f32 %v1189_v45, %v315_v43 }
  0xec   :  { %v364_v48 = vadd.f32 %v348_v46, %v263_v44 }
  0xee   :  { %v380_v49 = vmax.f32 %v364_v48, 0.0  ;;  %v222_v50 = vpop.permute.xlu1 %221 }
  0xef   :  { %v249_v55 = vmul.f32 %v1182_v42, %v222_v50 }
  0xf0   :  { %885 = vmatmul.mubr.f32.gmra.mxu1 %v380_v49 }
  0xf1   :  { %887 = vmatprep.mubr.f32.mxu1 %v381_v51  ;;  %v265_v58 = vadd.f32 %v249_v55, %v164_v56 }
  0xf3   :  { %v118_v52 = vpop.permute.xlu1 %117 }
  0xf4   :  { %v143_v61 = vmul.f32 %v1170_v35, %v118_v52 }
  0xf6   :  { %v165_v6 = vadd.f32 %v1176_v39, %v143_v61 }
  0xf7   :  { %v123_v54 = vpop.permute.xlu1 %122 }
  0xf8   :  { %v144_v60 = vmul.f32 %v1170_v35, %v123_v54  ;;  %v266_v11 = vadd.f32 %v250_v10, %v165_v6 }
  0xfa   :  { %v166_v2 = vadd.f32 %v1176_v39, %v144_v60  ;;  %v1263_v39 = vld [vmem:[%s1382_s4] ss:$0 sm:$0xff] }
  0xfc   :  { %v323_v9 = vpop.permute.xlu1 %322 }
  0xfd   :  { %v350_v59 = vmul.f32 %v1189_v45, %v323_v9 }
  0xff   :  { %v366_v62 = vadd.f32 %v350_v59, %v265_v58 }
 0x101   :  { %v382_v63 = vmax.f32 %v366_v62, 0.0  ;;  %v230_v0 = vpop.permute.xlu1 %229 }
 0x102   :  { %v251_v4 = vmul.f32 %v1182_v42, %v230_v0  ;;  %v1269_v42 = vld [vmem:[%s1383_s5] ss:$0 sm:$0xff] }
 0x103   :  { %888 = vmatmul.mubr.f32.gmra.mxu1 %v382_v63 }
 0x104   :  { %v267_v7 = vadd.f32 %v251_v4, %v166_v2 }
 0x106   :  { %v327_v3 = vpop.permute.xlu1 %326  ;;  %v368_v12 = vadd.f32 %v352_v8, %v267_v7 }
 0x107   :  { %v351_v35 = vmul.f32 %v1189_v45, %v327_v3 }
 0x108   :  { %v384_v15 = vmax.f32 %v368_v12, 0.0 }
 0x109   :  { %v367_v13 = vadd.f32 %v351_v35, %v266_v11 }
 0x10b   :  { %v383_v14 = vmax.f32 %v367_v13, 0.0 }
 0x10d   :  { %890 = vmatprep.mubr.f32.mxu1 %v383_v14 }
 0x10e   :  { %891 = vmatmul.mubr.f32.gmra.mxu1 %v384_v15 }
 0x151   :  { %v871_v16 = vpop.f32.mrf.mxu0 }
 0x152   :  { %v480_v17 = vadd.f32 %v871_v16, %v1263_v39 }
 0x153   :  { %v474_v18 = vpop.f32.mrf.mxu0 }
 0x154   :  { %v554_v45 = vmax.f32 %v480_v17, 0.0  ;;  %v475_v19 = vadd.f32 %v1263_v39, %v474_v18  ;;  %v663_v18 = vlaneseq }
 0x156   :  { %v553_v20 = vmax.f32 %v475_v19, 0.0  ;;  %v577_v21 = vmul.f32 %v1269_v42, %v554_v45  ;;  %v1302_v19 = vshrl.u32 %v663_v18, 7 }
 0x158   :  { %594 = vadd.xlane.f32.xlu0 %v577_v21  ;;  %v576_v22 = vmul.f32 %v1269_v42, %v553_v20  ;;  %v1307_v20 = vld [vmem:[%s1384_s6] ss:$0 sm:$0xff]  ;;  %s982_s6 = smov [#allocation2]  }
 0x159   :  { %s774_s27 = sshll.u32 %s982_s6, 4  ;;  %s775_s27 = int_to_ptr.vmem [resolvable:$true] %s774_s27 }
 0x15a   :  { %592 = vadd.xlane.f32.xlu1 %v576_v22  ;;  %s956_s28 = scalar_lea.vmem %s775_s27, 16  ;;  %s960_s29 = scalar_lea.vmem %s775_s27, 32 }
 0x15b   :  { %p957_p0 = scmp.ne.s32.totalorder %s775_s27, %s956_s28  ;;  %p961_p1 = scmp.lt.s32.totalorder %s775_s27, %s775_s27 }
 0x15c   :  { %p962_p2 = scmp.lt.s32.totalorder %s960_s29, %s956_s28 }
 0x15e   :  { %p963_p3 = por %p962_p2, %p961_p1 }
 0x160   :  { %p964_p4 = pnand %p963_p3, %p957_p0 }
 0x171   :  { %v874_v23 = vpop.f32.mrf.mxu0 }
 0x172   :  { %v490_v24 = vadd.f32 %v874_v23, %v1263_v39  ;;  %v1310_v23 = vand.u32 127, %v663_v18 }
 0x173   :  { %v484_v25 = vpop.f32.mrf.mxu0 }
 0x174   :  { %v556_v26 = vmax.f32 %v490_v24, 0.0  ;;  %v485_v27 = vadd.f32 %v1263_v39, %v484_v25  ;;  %vm682_vm0 = vcmp.eq.s32.totalorder %v1302_v19, %v1310_v23 }
 0x176   :  { %v555_v28 = vmax.f32 %v485_v27, 0.0  ;;  %v579_v29 = vmul.f32 %v1269_v42, %v556_v26 }
 0x177   :  { %v877_v30 = vpop.f32.mrf.mxu0 }
 0x178   :  { %v500_v31 = vadd.f32 %v877_v30, %v1263_v39  ;;  %598 = vadd.xlane.f32.xlu0 %v579_v29  ;;  %v578_v32 = vmul.f32 %v1269_v42, %v555_v28  ;;  %v981_v28 = vmov 0.0  }
 0x179   :  { %v494_v5 = vpop.f32.mrf.mxu0  ;;  %v789_v29 = vsel %vm682_vm0, 1.0, %v981_v28 }
 0x17a   :  { %v558_v33 = vmax.f32 %v500_v31, 0.0  ;;  %v495_v34 = vadd.f32 %v1263_v39, %v494_v5  ;;  %596 = vadd.xlane.f32.xlu1 %v578_v32  ;;  %v667_v5 = vadd.s32 24, %v1302_v19 }
 0x17c   :  { %v557_v36 = vmax.f32 %v495_v34, 0.0  ;;  %v581_v37 = vmul.f32 %v1269_v42, %v558_v33  ;;  %v668_v34 = vadd.s32 32, %v1302_v19  ;;  %vm685_vm3 = vcmp.eq.s32.totalorder %v667_v5, %v1310_v23 }
 0x17e   :  { %602 = vadd.xlane.f32.xlu0 %v581_v37  ;;  %v580_v38 = vmul.f32 %v1269_v42, %v557_v36  ;;  %vm686_vm4 = vcmp.eq.s32.totalorder %v668_v34, %v1310_v23 }
 0x180   :  { %600 = vadd.xlane.f32.xlu1 %v580_v38 }
 0x18a   :  { %v880_v40 = vpop.f32.mrf.mxu0 }
 0x18b   :  { %v510_v41 = vadd.f32 %v880_v40, %v1263_v39 }
 0x18c   :  { %v504_v43 = vpop.f32.mrf.mxu0 }
 0x18d   :  { %v560_v44 = vmax.f32 %v510_v41, 0.0  ;;  %v505_v46 = vadd.f32 %v1263_v39, %v504_v43 }
 0x18f   :  { %v559_v47 = vmax.f32 %v505_v46, 0.0  ;;  %v583_v48 = vmul.f32 %v1269_v42, %v560_v44  ;;  %v669_v46 = vadd.s32 40, %v1302_v19 }
 0x191   :  { %606 = vadd.xlane.f32.xlu0 %v583_v48  ;;  %v582_v49 = vmul.f32 %v1269_v42, %v559_v47  ;;  %vm687_vm5 = vcmp.eq.s32.totalorder %v669_v46, %v1310_v23 }
 0x193   :  { %604 = vadd.xlane.f32.xlu1 %v582_v49 }
 0x19d   :  { %v883_v50 = vpop.f32.mrf.mxu1 }
 0x19e   :  { %v520_v51 = vadd.f32 %v883_v50, %v1263_v39 }
 0x19f   :  { %v514_v52 = vpop.f32.mrf.mxu1 }
 0x1a0   :  { %v562_v53 = vmax.f32 %v520_v51, 0.0  ;;  %v515_v54 = vadd.f32 %v1263_v39, %v514_v52  ;;  %v670_v52 = vadd.s32 48, %v1302_v19 }
 0x1a2   :  { %v561_v55 = vmax.f32 %v515_v54, 0.0  ;;  %v585_v56 = vmul.f32 %v1269_v42, %v562_v53  ;;  %v792_v53 = vsel %vm685_vm3, 1.0, %v981_v28  ;;  %v793_v54 = vsel %vm686_vm4, 1.0, %v981_v28 }
 0x1a3   :  { %vm688_vm6 = vcmp.eq.s32.totalorder %v670_v52, %v1310_v23 }
 0x1a4   :  { %610 = vadd.xlane.f32.xlu0 %v585_v56  ;;  %v584_v9 = vmul.f32 %v1269_v42, %v561_v55 }
 0x1a6   :  { %608 = vadd.xlane.f32.xlu1 %v584_v9 }
 0x1b0   :  { %v886_v57 = vpop.f32.mrf.mxu1 }
 0x1b1   :  { %v530_v58 = vadd.f32 %v886_v57, %v1263_v39 }
 0x1b2   :  { %v524_v59 = vpop.f32.mrf.mxu1 }
 0x1b3   :  { %v564_v60 = vmax.f32 %v530_v58, 0.0  ;;  %v525_v61 = vadd.f32 %v1263_v39, %v524_v59  ;;  %v671_v59 = vadd.s32 56, %v1302_v19 }
 0x1b5   :  { %v563_v62 = vmax.f32 %v525_v61, 0.0  ;;  %v587_v63 = vmul.f32 %v1269_v42, %v564_v60  ;;  %vm689_vm7 = vcmp.eq.s32.totalorder %v671_v59, %v1310_v23 }
 0x1b7   :  { %614 = vadd.xlane.f32.xlu0 %v587_v63  ;;  %v586_v0 = vmul.f32 %v1269_v42, %v563_v62 }
 0x1b9   :  { %612 = vadd.xlane.f32.xlu1 %v586_v0 }
 0x1c3   :  { %v889_v1 = vpop.f32.mrf.mxu1 }
 0x1c4   :  { %v540_v2 = vadd.f32 %v889_v1, %v1263_v39  ;;  %v672_v1 = vadd.s32 64, %v1302_v19 }
 0x1c5   :  { %v534_v4 = vpop.f32.mrf.mxu1 }
 0x1c6   :  { %v566_v6 = vmax.f32 %v540_v2, 0.0  ;;  %v535_v7 = vadd.f32 %v1263_v39, %v534_v4  ;;  %v794_v2 = vsel %vm687_vm5, 1.0, %v981_v28  ;;  %v795_v4 = vsel %vm688_vm6, 1.0, %v981_v28 }
 0x1c7   :  { %vm690_vm8 = vcmp.eq.s32.totalorder %v672_v1, %v1310_v23 }
 0x1c8   :  { %v565_v8 = vmax.f32 %v535_v7, 0.0  ;;  %v589_v10 = vmul.f32 %v1269_v42, %v566_v6  ;;  %v797_v18 = vsel %vm690_vm8, 1.0, %v981_v28 }
 0x1ca   :  { %618 = vadd.xlane.f32.xlu0 %v589_v10  ;;  %v588_v3 = vmul.f32 %v1269_v42, %v565_v8 }
 0x1cc   :  { %616 = vadd.xlane.f32.xlu1 %v588_v3 }
 0x1ce   :  { %v892_v11 = vpop.f32.mrf.mxu1 }
 0x1cf   :  { %v550_v35 = vadd.f32 %v892_v11, %v1263_v39  ;;  %v673_v11 = vadd.s32 72, %v1302_v19 }
 0x1d0   :  { %v544_v12 = vpop.f32.mrf.mxu1 }
 0x1d1   :  { %v568_v13 = vmax.f32 %v550_v35, 0.0  ;;  %v545_v14 = vadd.f32 %v1263_v39, %v544_v12  ;;  %v665_v39 = vadd.s32 8, %v1302_v19  ;;  %vm691_vm9 = vcmp.eq.s32.totalorder %v673_v11, %v1310_v23 }
 0x1d3   :  { %v567_v15 = vmax.f32 %v545_v14, 0.0  ;;  %v591_v16 = vmul.f32 %v1269_v42, %v568_v13  ;;  %vm683_vm1 = vcmp.eq.s32.totalorder %v665_v39, %v1310_v23 }
 0x1d4   :  { %v790_v36 = vsel %vm683_vm1, 1.0, %v981_v28 }
 0x1d5   :  { %622 = vadd.xlane.f32.xlu0 %v591_v16  ;;  %v590_v17 = vmul.f32 %v1269_v42, %v567_v15  ;;  %v666_v42 = vadd.s32 16, %v1302_v19  ;;  %v674_v16 = vadd.s32 80, %v1302_v19 }
 0x1d7   :  { %620 = vadd.xlane.f32.xlu1 %v590_v17  ;;  %vm684_vm2 = vcmp.eq.s32.totalorder %v666_v42, %v1310_v23  ;;  %v796_v17 = vsel %vm689_vm7, 1.0, %v981_v28  ;;  %vm692_vm10 = vcmp.eq.s32.totalorder %v674_v16, %v1310_v23  ;;  %v675_v42 = vadd.s32 88, %v1302_v19 }
 0x1d8   :  { %v791_v37 = vsel %vm684_vm2, 1.0, %v981_v28 }
 0x1d9   :  { %vm693_vm11 = vcmp.eq.s32.totalorder %v675_v42, %v1310_v23 }
 0x1e1   :  { %v595_v21 = vpop.xlane.xlu0 %594 }
 0x1e2   :  { %v632_v25 = vadd.f32 %v1307_v20, %v595_v21 }
 0x1e3   :  { %v593_v45 = vpop.xlane.xlu1 %592 }
 0x1e4   :  { %v631_v24 = vadd.f32 %v1307_v20, %v593_v45  ;;  %v648_v32 = vmax.f32 %v632_v25, 0.0 }
 0x1e6   :  { %v647_v27 = vmax.f32 %v631_v24, 0.0  ;;  %v731_v43 = vmul.f32 %v790_v36, %v648_v32  ;;  %v799_v32 = vsel %vm692_vm10, 1.0, %v981_v28 }
 0x1e8   :  { %v730_v38 = vmul.f32 %v789_v29, %v647_v27 }
 0x1ea   :  { %v746_v49 = vadd.f32 %v731_v43, %v730_v38 }
 0x201   :  { %v599_v30 = vpop.xlane.xlu0 %598 }
 0x202   :  { %v634_v40 = vadd.f32 %v1307_v20, %v599_v30  ;;  %v676_v30 = vadd.s32 96, %v1302_v19 }
 0x203   :  { %v597_v22 = vpop.xlane.xlu1 %596 }
 0x204   :  { %v633_v26 = vadd.f32 %v1307_v20, %v597_v22  ;;  %v650_v50 = vmax.f32 %v634_v40, 0.0  ;;  %vm694_vm12 = vcmp.eq.s32.totalorder %v676_v30, %v1310_v23 }
 0x206   :  { %v649_v33 = vmax.f32 %v633_v26, 0.0  ;;  %v733_v57 = vmul.f32 %v792_v53, %v650_v50 }
 0x207   :  { %v603_v47 = vpop.xlane.xlu0 %602 }
 0x208   :  { %v732_v44 = vmul.f32 %v791_v37, %v649_v33  ;;  %v636_v56 = vadd.f32 %v1307_v20, %v603_v47  ;;  %v800_v47 = vsel %vm693_vm11, 1.0, %v981_v28 }
 0x209   :  { %v601_v31 = vpop.xlane.xlu1 %600 }
 0x20a   :  { %v635_v41 = vadd.f32 %v1307_v20, %v601_v31  ;;  %v747_v55 = vadd.f32 %v746_v49, %v732_v44  ;;  %v652_v62 = vmax.f32 %v636_v56, 0.0  ;;  %v798_v31 = vsel %vm691_vm9, 1.0, %v981_v28 }
 0x20b   :  { %v677_v44 = vadd.s32 104, %v1302_v19 }
 0x20c   :  { %v651_v51 = vmax.f32 %v635_v41, 0.0  ;;  %v748_v63 = vadd.f32 %v747_v55, %v733_v57  ;;  %v735_v10 = vmul.f32 %v794_v2, %v652_v62 }
 0x20d   :  { %vm695_vm13 = vcmp.eq.s32.totalorder %v677_v44, %v1310_v23 }
 0x20e   :  { %v734_v58 = vmul.f32 %v793_v54, %v651_v51  ;;  %v678_v51 = vadd.s32 112, %v1302_v19  ;;  %v679_v54 = vadd.s32 120, %v1302_v19 }
 0x210   :  { %v749_v6 = vadd.f32 %v748_v63, %v734_v58  ;;  %vm696_vm14 = vcmp.eq.s32.totalorder %v678_v51, %v1310_v23  ;;  %v802_v58 = vsel %vm695_vm13, 1.0, %v981_v28  ;;  %vm697_vm15 = vcmp.eq.s32.totalorder %v679_v54, %v1310_v23 }
 0x211   :  { %v803_v62 = vsel %vm696_vm14, 1.0, %v981_v28  ;;  %v804_v1 = vsel %vm697_vm15, 1.0, %v981_v28 }
 0x212   :  { %v750_v14 = vadd.f32 %v749_v6, %v735_v10 }
 0x21a   :  { %v607_v60 = vpop.xlane.xlu0 %606 }
 0x21b   :  { %v638_v7 = vadd.f32 %v1307_v20, %v607_v60 }
 0x21c   :  { %v605_v48 = vpop.xlane.xlu1 %604 }
 0x21d   :  { %v637_v9 = vadd.f32 %v1307_v20, %v605_v48  ;;  %v654_v13 = vmax.f32 %v638_v7, 0.0  ;;  %v801_v48 = vsel %vm694_vm12, 1.0, %v981_v28 }
 0x21f   :  { %v653_v0 = vmax.f32 %v637_v9, 0.0  ;;  %v737_v39 = vmul.f32 %v796_v17, %v654_v13 }
 0x221   :  { %v736_v3 = vmul.f32 %v795_v4, %v653_v0 }
 0x223   :  { %v751_v45 = vadd.f32 %v750_v14, %v736_v3 }
 0x225   :  { %v752_v27 = vadd.f32 %v751_v45, %v737_v39 }
 0x22d   :  { %v611_v35 = vpop.xlane.xlu0 %610 }
 0x22e   :  { %v640_v21 = vadd.f32 %v1307_v20, %v611_v35 }
 0x22f   :  { %v609_v61 = vpop.xlane.xlu1 %608 }
 0x230   :  { %v639_v8 = vadd.f32 %v1307_v20, %v609_v61  ;;  %v656_v26 = vmax.f32 %v640_v21, 0.0 }
 0x232   :  { %v655_v15 = vmax.f32 %v639_v8, 0.0  ;;  %v739_v37 = vmul.f32 %v798_v31, %v656_v26 }
 0x234   :  { %v738_v24 = vmul.f32 %v797_v18, %v655_v15 }
 0x236   :  { %v753_v5 = vadd.f32 %v752_v27, %v738_v24 }
 0x238   :  { %v754_v43 = vadd.f32 %v753_v5, %v739_v37 }
 0x240   :  { %v615_v25 = vpop.xlane.xlu0 %614 }
 0x241   :  { %v642_v33 = vadd.f32 %v1307_v20, %v615_v25 }
 0x242   :  { %v613_v12 = vpop.xlane.xlu1 %612 }
 0x243   :  { %v641_v22 = vadd.f32 %v1307_v20, %v613_v12  ;;  %v658_v41 = vmax.f32 %v642_v33, 0.0 }
 0x245   :  { %v657_v29 = vmax.f32 %v641_v22, 0.0  ;;  %v741_v52 = vmul.f32 %v800_v47, %v658_v41 }
 0x247   :  { %v740_v38 = vmul.f32 %v799_v32, %v657_v29 }
 0x249   :  { %v755_v49 = vadd.f32 %v754_v43, %v740_v38 }
 0x24b   :  { %v756_v9 = vadd.f32 %v755_v49, %v741_v52 }
 0x253   :  { %v619_v40 = vpop.xlane.xlu0 %618 }
 0x254   :  { %v644_v50 = vadd.f32 %v1307_v20, %v619_v40 }
 0x255   :  { %v617_v34 = vpop.xlane.xlu1 %616 }
 0x256   :  { %v643_v36 = vadd.f32 %v1307_v20, %v617_v34  ;;  %v660_v56 = vmax.f32 %v644_v50, 0.0 }
 0x258   :  { %v659_v46 = vmax.f32 %v643_v36, 0.0  ;;  %v743_v63 = vmul.f32 %v802_v58, %v660_v56 }
 0x25a   :  { %v742_v53 = vmul.f32 %v801_v48, %v659_v46 }
 0x25c   :  { %v757_v60 = vadd.f32 %v756_v9, %v742_v53 }
 0x25e   :  { %v623_v55 = vpop.xlane.xlu0 %622  ;;  %v758_v4 = vadd.f32 %v757_v60, %v743_v63 }
 0x25f   :  { %v646_v57 = vadd.f32 %v1307_v20, %v623_v55 }
 0x260   :  { %v621_v59 = vpop.xlane.xlu1 %620 }
 0x261   :  { %v645_v61 = vadd.f32 %v1307_v20, %v621_v59  ;;  %v662_v0 = vmax.f32 %v646_v57, 0.0 }
 0x263   :  { %v661_v19 = vmax.f32 %v645_v61, 0.0  ;;  %v745_v6 = vmul.f32 %v804_v1, %v662_v0 }
 0x265   :  { %v744_v2 = vmul.f32 %v803_v62, %v661_v19 }
 0x267   :  { %v759_v7 = vadd.f32 %v758_v4, %v744_v2 }
 0x269   :  { %v760_v8 = vadd.f32 %v759_v7, %v745_v6 }
 0x26b   :  { %v761_v10 = vrot.slane %v760_v8, 4 }
 0x26d   :  { %v762_v3 = vadd.f32 %v761_v10, %v760_v8 }
 0x26f   :  { %v763_v11 = vrot.slane %v762_v3, 2 }
 0x271   :  { %v764_v35 = vadd.f32 %v763_v11, %v762_v3 }
 0x273   :  { %v765_v23 = vrot.slane %v764_v35, 1 }
 0x275   :  { %v766_v20 = vadd.f32 %v765_v23, %v764_v35 }
 0x277   :  { %767 = vst [vmem:[#allocation2] sm:$0x1] %v766_v20 }
 0x278   :  { %967 = shalt.err (!%p964_p4)
}
 0x279   :  { %777 = dma.vmem_to_hbm [thread:$0]  %s775_s27, 16, %s1385_s7, [#allocation3]  }
 0x27a   :  { %976 = dma.done.wait [#allocation3], 16  }
 0x27b   :  { %977 = vsyncadd [#allocation3], 4294967280 }
 0x27c   :  { %781 = vsyncpa [#allocation3], 1 }

</bundles_post_ra>
